<compile_context>
chip_gen: v6e
topology: v6e:2x2x1
jax: 0.10.0
libtpu: 0.0.40
codegen_flags: <defaults>
</compile_context>

<pallas_src>
import functools

import jax
import jax.numpy as jnp
from jax.experimental import pallas as pl
from jax.experimental.pallas import tpu as pltpu


def _round_up(x, m):
    return (x + m - 1) // m * m


def _vision_expert_mlp_kernel(expert_ref, x_ref, gu_ref, dn_ref, o_ref,
                              acc_ref, *, tf):
    # expert_ref (scalar prefetch) is consumed only by the weight index_maps.
    del expert_ref
    fi = pl.program_id(1)
    nf = pl.num_programs(1)

    @pl.when(fi == 0)
    def _():
        acc_ref[...] = jnp.zeros_like(acc_ref)

    # One MXU pass for the packed [gate | up] chunk, f32 accumulation.
    gu = jnp.dot(x_ref[...], gu_ref[0], preferred_element_type=jnp.float32)
    g = gu[:, :tf]
    u = gu[:, tf:]
    h = (g * jax.nn.sigmoid(g)) * u                     # silu(gate) * up
    acc_ref[...] += jnp.dot(h.astype(jnp.bfloat16), dn_ref[0],
                            preferred_element_type=jnp.float32)

    @pl.when(fi == nf - 1)
    def _():
        o_ref[...] = acc_ref[...].astype(o_ref.dtype)


def _pack_gate_up(gate, up, f_pad, tf):
    """Pack gate/up (D, F) into (D, 2*F_pad) laid out as tf-sized [g|u] chunks."""
    d, f = gate.shape
    if f_pad != f:
        gate = jnp.pad(gate, ((0, 0), (0, f_pad - f)))
        up = jnp.pad(up, ((0, 0), (0, f_pad - f)))
    nf = f_pad // tf
    gu = jnp.concatenate(
        [gate.reshape(d, nf, tf), up.reshape(d, nf, tf)], axis=2)
    return gu.reshape(d, 2 * f_pad).astype(jnp.bfloat16)


def _pack_down(down, f_pad):
    f, d = down.shape
    if f_pad != f:
        down = jnp.pad(down, ((0, f_pad - f), (0, 0)))
    return down.astype(jnp.bfloat16)


def vision_expert_mlp(hidden_states, vision_token_mask, params, *,
                      tm=512, tf=512):
    """hidden_states: (B, L, D); vision_token_mask: (B, L) bool."""
    B, L, D = hidden_states.shape
    N = B * L
    F = params["gate_v"].shape[1]
    assert D % 128 == 0, "hidden size must be a multiple of 128 (lane width)"

    # ---- tile sizes: token tile tm_eff (MXU-row aligned), F tile tf_eff ----
    tm_eff = min(tm, _round_up(N, 128))
    tm_eff = max(128, (tm_eff // 128) * 128)
    tf_eff = min(tf, _round_up(F, 128))
    tf_eff = max(128, (tf_eff // 128) * 128)

    out_bytes = jnp.dtype(hidden_states.dtype).itemsize

    def vmem_est(tm_e, tf_e):
        return (2 * (D * 2 * tf_e * 2)         # [gate|up] weight tile x2 bufs (bf16)
                + 2 * (tf_e * D * 2)           # down weight tile x2 bufs (bf16)
                + 2 * (tm_e * D * 2)           # x tile x2 bufs (bf16)
                + 2 * (tm_e * D * out_bytes)   # out tile x2 bufs
                + tm_e * D * 4                 # f32 accumulator scratch
                + tm_e * 2 * tf_e * 4          # gate|up f32 temporary
                + tm_e * tf_e * 4              # h temporary
                + tm_e * D * 4)                # down-result f32 temporary

    try:
        vmem_cap = int(pltpu.get_tpu_info().vmem_capacity_bytes)
    except Exception:
        vmem_cap = 64 * 2 ** 20                # conservative (v7x per-core VMEM)
    budget = int(vmem_cap * 0.85)
    while vmem_est(tm_eff, tf_eff) > budget and tf_eff > 256:
        tf_eff = max(128, ((tf_eff // 2) // 128) * 128)
    while vmem_est(tm_eff, tf_eff) > budget and tm_eff > 128:
        tm_eff = max(128, ((tm_eff // 2) // 128) * 128)
    vmem_limit = int(min(vmem_cap * 0.9,
                         max(32 * 2 ** 20, vmem_est(tm_eff, tf_eff) * 1.25)))

    f_pad = _round_up(F, tf_eff)
    nf = f_pad // tf_eff
    # One spare tile absorbs the vision/language segment-boundary padding.
    n_pad = _round_up(N, tm_eff) + tm_eff
    n_tiles = n_pad // tm_eff

    # ---- sort tokens so vision and language occupy disjoint token tiles ----
    xf = hidden_states.reshape(N, D)
    mask = vision_token_mask.reshape(N).astype(bool)
    nv = jnp.sum(mask.astype(jnp.int32))

    vis_rank = jnp.cumsum(mask.astype(jnp.int32)) - 1
    lang_rank = jnp.cumsum(jnp.logical_not(mask).astype(jnp.int32)) - 1
    lang_base = ((nv + tm_eff - 1) // tm_eff) * tm_eff      # language segment start
    dest = jnp.where(mask, vis_rank, lang_base + lang_rank).astype(jnp.int32)

    # source row per sorted/padded destination (row N is an all-zero pad row)
    src = jnp.full((n_pad,), N, dtype=jnp.int32).at[dest].set(
        jnp.arange(N, dtype=jnp.int32))
    x_pad = jnp.concatenate(
        [xf.astype(jnp.bfloat16), jnp.zeros((1, D), jnp.bfloat16)], axis=0)
    x_sorted = x_pad[src]                                   # (n_pad, D) bf16

    # per-tile expert id (0 = vision, 1 = language) -> drives the weight DMAs
    n_vis_tiles = (nv + tm_eff - 1) // tm_eff
    expert_id = (jnp.arange(n_tiles, dtype=jnp.int32) >= n_vis_tiles
                 ).astype(jnp.int32)

    # ---- weights: stacked per expert, [gate|up] packed per F-chunk, bf16 ----
    gu_v = _pack_gate_up(params["gate_v"], params["up_v"], f_pad, tf_eff)
    gu_l = _pack_gate_up(params["gate_l"], params["up_l"], f_pad, tf_eff)
    w_gu = jnp.stack([gu_v, gu_l], axis=0)                  # (2, D, 2*f_pad)
    w_dn = jnp.stack([_pack_down(params["down_v"], f_pad),
                      _pack_down(params["down_l"], f_pad)], axis=0)  # (2, f_pad, D)

    kernel = functools.partial(_vision_expert_mlp_kernel, tf=tf_eff)

    out_sorted = pl.pallas_call(
        kernel,
        out_shape=jax.ShapeDtypeStruct((n_pad, D), hidden_states.dtype),
        grid_spec=pltpu.PrefetchScalarGridSpec(
            num_scalar_prefetch=1,
            grid=(n_tiles, nf),
            in_specs=[
                pl.BlockSpec((tm_eff, D), lambda ti, fi, eid: (ti, 0)),
                # expert-gated weight DMAs: only the needed expert's chunk streams
                pl.BlockSpec((1, D, 2 * tf_eff),
                             lambda ti, fi, eid: (eid[ti], 0, fi)),
                pl.BlockSpec((1, tf_eff, D),
                             lambda ti, fi, eid: (eid[ti], fi, 0)),
            ],
            out_specs=pl.BlockSpec((tm_eff, D), lambda ti, fi, eid: (ti, 0)),
            scratch_shapes=[pltpu.VMEM((tm_eff, D), jnp.float32)],
        ),
        compiler_params=pltpu.CompilerParams(
            dimension_semantics=("parallel", "arbitrary"),
            vmem_limit_bytes=vmem_limit,
        ),
    )(expert_id, x_sorted, w_gu, w_dn)

    out = out_sorted[dest]                  # gather back to original token order
    return out.reshape(B, L, D)


def _reference(hidden_states, vision_token_mask, params):
    """Pure-JAX reference mirroring the kernel's bf16-operand / f32-acc math."""
    def bf(a):
        return a.astype(jnp.bfloat16).astype(jnp.float32)

    x = bf(hidden_states)

    def mlp(x, g, u, d):
        gate = x @ bf(g)
        up = x @ bf(u)
        h = jax.nn.silu(gate) * up
        return bf(h) @ bf(d)

    ov = mlp(x, params["gate_v"], params["up_v"], params["down_v"])
    ol = mlp(x, params["gate_l"], params["up_l"], params["down_l"])
    out = jnp.where(vision_token_mask[..., None], ov, ol)
    return out.astype(hidden_states.dtype)


if __name__ == "__main__":
    # Small but lane-dense config: hidden_size=128, intermediate_size=256.
    B, L, D, F = 2, 8, 128, 256

    key = jax.random.PRNGKey(0)
    kx, km, k1, k2, k3, k4, k5, k6 = jax.random.split(key, 8)

    hidden_states = jax.random.normal(kx, (B, L, D), dtype=jnp.float32)
    vision_token_mask = jax.random.bernoulli(km, 0.5, (B, L))

    scale = 0.05
    params = {
        "gate_v": scale * jax.random.normal(k1, (D, F), dtype=jnp.float32),
        "up_v":   scale * jax.random.normal(k2, (D, F), dtype=jnp.float32),
        "down_v": scale * jax.random.normal(k3, (F, D), dtype=jnp.float32),
        "gate_l": scale * jax.random.normal(k4, (D, F), dtype=jnp.float32),
        "up_l":   scale * jax.random.normal(k5, (D, F), dtype=jnp.float32),
        "down_l": scale * jax.random.normal(k6, (F, D), dtype=jnp.float32),
    }

    out = vision_expert_mlp(hidden_states, vision_token_mask, params)
    out = jax.block_until_ready(out)

    ref = _reference(hidden_states, vision_token_mask, params)
    assert out.shape == (B, L, D)
    assert jnp.allclose(out, ref, atol=2e-2, rtol=2e-2), "mismatch vs reference"

    print("KERNEL_OK")
</pallas_src>

<mosaic_0001>
module attributes {stable_mosaic.version = 11 : i64} {
  func.func @_vision_expert_mlp_kernel(%arg0: i32, %arg1: i32, %arg2: memref<2xi32, #tpu.memory_space<smem>>, %arg3: memref<128x128xbf16, #tpu.memory_space<vmem>>, %arg4: memref<1x128x512xbf16, #tpu.memory_space<vmem>>, %arg5: memref<1x256x128xbf16, #tpu.memory_space<vmem>>, %arg6: memref<128x128xf32, #tpu.memory_space<vmem>>, %arg7: memref<128x128xf32, #tpu.memory_space<vmem>>) attributes {dimension_semantics = [#tpu.dimension_semantics<parallel>, #tpu.dimension_semantics<arbitrary>], iteration_bounds = array<i64: 2, 1>, scalar_prefetch = 1 : i64, scratch_operands = 1 : i64, tpu.core_type = #tpu.core_type<tc>, window_params = [{transform_indices = @transform_0, window_bounds = array<i64: 128, 128>}, {transform_indices = @transform_1, window_bounds = array<i64: 1, 128, 512>}, {transform_indices = @transform_2, window_bounds = array<i64: 1, 256, 128>}, {transform_indices = @transform_3, window_bounds = array<i64: 128, 128>}]} {
    %c0_i32 = arith.constant 0 : i32
    %0 = arith.cmpi eq, %arg1, %c0_i32 : i32
    %1 = arith.extui %0 : i1 to i32
    %c0_i32_0 = arith.constant 0 : i32
    %2 = arith.cmpi ne, %1, %c0_i32_0 : i32
    scf.if %2 {
      %cst_16 = arith.constant 0.000000e+00 : f32
      %26 = vector.broadcast %cst_16 : f32 to vector<128x128xf32>
      %c0_17 = arith.constant 0 : index
      %c0_18 = arith.constant 0 : index
      %27 = vector.load %arg7[%c0_17, %c0_18] : memref<128x128xf32, #tpu.memory_space<vmem>>, vector<128x128xf32>
      tpu.vector_store %arg7[%c0_17, %c0_18], %26 {strides = array<i32>} : memref<128x128xf32, #tpu.memory_space<vmem>>, vector<128x128xf32>,
    } else {
    }
    %c0 = arith.constant 0 : index
    %c0_1 = arith.constant 0 : index
    %3 = vector.load %arg3[%c0, %c0_1] : memref<128x128xbf16, #tpu.memory_space<vmem>>, vector<128x128xbf16>
    %c0_2 = arith.constant 0 : index
    %c0_3 = arith.constant 0 : index
    %c0_4 = arith.constant 0 : index
    %4 = vector.load %arg4[%c0_2, %c0_3, %c0_4] : memref<1x128x512xbf16, #tpu.memory_space<vmem>>, vector<1x128x512xbf16>
    %5 = vector.shape_cast %4 : vector<1x128x512xbf16> to vector<128x512xbf16>
    %cst = arith.constant dense<0.000000e+00> : vector<128x512xf32>
    %6 = tpu.matmul %3, %5, %cst {dimension_numbers = #tpu.dot_dimension_numbers<[1], [0], [0], [1], [0, 0, 1, 1], [], []>} : vector<128x128xbf16>, vector<128x512xbf16>, vector<128x512xf32> -> vector<128x512xf32>
    %7 = vector.extract_strided_slice %6 {offsets = [0, 0], sizes = [128, 256], strides = [1, 1]} : vector<128x512xf32> to vector<128x256xf32>
    %8 = vector.extract_strided_slice %6 {offsets = [0, 256], sizes = [128, 256], strides = [1, 1]} : vector<128x512xf32> to vector<128x256xf32>
    %9 = arith.negf %7 : vector<128x256xf32>
    %10 = math.exp %9 : vector<128x256xf32>
    %cst_5 = arith.constant 1.000000e+00 : f32
    %11 = vector.broadcast %cst_5 : f32 to vector<128x256xf32>
    %12 = arith.addf %11, %10 : vector<128x256xf32>
    %13 = arith.divf %11, %12 : vector<128x256xf32>
    %14 = arith.mulf %7, %13 : vector<128x256xf32>
    %15 = arith.mulf %14, %8 : vector<128x256xf32>
    %c0_6 = arith.constant 0 : index
    %c0_7 = arith.constant 0 : index
    %16 = vector.load %arg7[%c0_6, %c0_7] : memref<128x128xf32, #tpu.memory_space<vmem>>, vector<128x128xf32>
    %17 = arith.truncf %15 : vector<128x256xf32> to vector<128x256xbf16>
    %c0_8 = arith.constant 0 : index
    %c0_9 = arith.constant 0 : index
    %c0_10 = arith.constant 0 : index
    %18 = vector.load %arg5[%c0_8, %c0_9, %c0_10] : memref<1x256x128xbf16, #tpu.memory_space<vmem>>, vector<1x256x128xbf16>
    %19 = vector.shape_cast %18 : vector<1x256x128xbf16> to vector<256x128xbf16>
    %cst_11 = arith.constant dense<0.000000e+00> : vector<128x128xf32>
    %20 = tpu.matmul %17, %19, %cst_11 {dimension_numbers = #tpu.dot_dimension_numbers<[1], [0], [0], [1], [0, 0, 1, 1], [], []>} : vector<128x256xbf16>, vector<256x128xbf16>, vector<128x128xf32> -> vector<128x128xf32>
    %21 = arith.addf %16, %20 : vector<128x128xf32>
    %c0_12 = arith.constant 0 : index
    %c0_13 = arith.constant 0 : index
    %22 = vector.load %arg7[%c0_12, %c0_13] : memref<128x128xf32, #tpu.memory_space<vmem>>, vector<128x128xf32>
    tpu.vector_store %arg7[%c0_12, %c0_13], %21 {strides = array<i32>} : memref<128x128xf32, #tpu.memory_space<vmem>>, vector<128x128xf32>,
    %c0_i32_14 = arith.constant 0 : i32
    %23 = arith.cmpi eq, %arg1, %c0_i32_14 : i32
    %24 = arith.extui %23 : i1 to i32
    %c0_i32_15 = arith.constant 0 : i32
    %25 = arith.cmpi ne, %24, %c0_i32_15 : i32
    scf.if %25 {
      %c0_16 = arith.constant 0 : index
      %c0_17 = arith.constant 0 : index
      %26 = vector.load %arg7[%c0_16, %c0_17] : memref<128x128xf32, #tpu.memory_space<vmem>>, vector<128x128xf32>
      %c0_18 = arith.constant 0 : index
      %c0_19 = arith.constant 0 : index
      %27 = vector.load %arg6[%c0_18, %c0_19] : memref<128x128xf32, #tpu.memory_space<vmem>>, vector<128x128xf32>
      tpu.vector_store %arg6[%c0_18, %c0_19], %26 {strides = array<i32>} : memref<128x128xf32, #tpu.memory_space<vmem>>, vector<128x128xf32>,
    } else {
    }
    return
  }
  func.func @transform_0(%arg0: i32, %arg1: i32, %arg2: memref<2xi32, #tpu.memory_space<smem>>) -> (i32, i32) {
    %c0_i32 = arith.constant 0 : i32
    %c0_i32_0 = arith.constant 0 : i32
    return %arg0, %c0_i32 : i32, i32
  }
  func.func @transform_1(%arg0: i32, %arg1: i32, %arg2: memref<2xi32, #tpu.memory_space<smem>>) -> (i32, i32, i32) {
    %0 = arith.index_cast %arg0 : i32 to index
    %1 = memref.load %arg2[%0] : memref<2xi32, #tpu.memory_space<smem>>
    %c0_i32 = arith.constant 0 : i32
    %c0_i32_0 = arith.constant 0 : i32
    return %1, %c0_i32, %arg1 : i32, i32, i32
  }
  func.func @transform_2(%arg0: i32, %arg1: i32, %arg2: memref<2xi32, #tpu.memory_space<smem>>) -> (i32, i32, i32) {
    %0 = arith.index_cast %arg0 : i32 to index
    %1 = memref.load %arg2[%0] : memref<2xi32, #tpu.memory_space<smem>>
    %c0_i32 = arith.constant 0 : i32
    %c0_i32_0 = arith.constant 0 : i32
    return %1, %arg1, %c0_i32 : i32, i32, i32
  }
  func.func @transform_3(%arg0: i32, %arg1: i32, %arg2: memref<2xi32, #tpu.memory_space<smem>>) -> (i32, i32) {
    %c0_i32 = arith.constant 0 : i32
    %c0_i32_0 = arith.constant 0 : i32
    return %arg0, %c0_i32 : i32, i32
  }
}

</mosaic_0001>

<bundles_post_ra>
// kernel: tpu_custom_call.1
= control target key start
LH: loop header
LB: loop body
LE: loop exit
PB: predicated region body
PF: predicated region fallthrough
CT: control target
= control target key end

     0   :  { %s2293_s15 = smov [#allocation4]   ;;  %s2969_s0 = inlined_call_operand.hbm [shape: s32[2], index: 0, kind: input, shape index: {}]   ;;  %s2970_s1 = inlined_call_operand.hbm [shape: bf16[256,128], index: 1, kind: input, shape index: {}]   ;;  %s2971_s2 = inlined_call_operand.hbm [shape: bf16[2,128,512], index: 2, kind: input, shape index: {}]   ;;  %s2972_s3 = inlined_call_operand.hbm [shape: bf16[2,256,128], index: 3, kind: input, shape index: {}]   ;;  %s2973_s4 = inlined_call_operand.hbm [shape: f32[256,128], index: 4, kind: output, shape index: {}]  }
   0x1   :  { %2987 = sst [smem:[#allocation26_spill]] %s2971_s2 }
   0x2   :  { %2988 = sst [smem:[#allocation27_spill]] %s2973_s4 }
   0x3   :  { %10 = dma.hbm_to_smem %s2969_s0, 16, %s2293_s15, [#allocation3] }
   0x4   :  { %2227 = dma.done.wait [#allocation3], 16 }
   0x5   :  { %2228 = vsyncadd [#allocation3], 4294967280 }
   0x6   :  { %12 = sfence }
   0x7   :  { %13 = vsyncpa [#allocation6], 0 }
   0x8   :  { %15 = vsyncpa [#allocation6 + $0x1], 0 }
   0x9   :  { %16 = vsyncpa [#allocation9], 0 }
   0xa   :  { %18 = vsyncpa [#allocation9 + $0x1], 0 }
   0xb   :  { %19 = vsyncpa [#allocation7], 0 }
   0xc   :  { %21 = vsyncpa [#allocation7 + $0x1], 0  ;;  %s2333_s18 = smov 0   ;;  %s2335_s19 = smov 0  }
   0xd   :  { %s2337_s20 = smov 0   ;;  %s2339_s21 = smov 0  }
   0xe   :  { %s2341_s22 = smov 0   ;;  %s2343_s0 = smov 0  }
   0xf   :  { %s2345_s23 = smov 0   ;;  %s2347_s24 = smov 0  }
  0x10   :  { %s2349_s25 = smov 0   ;;  %s2351_s26 = smov 0  }
  0x11   :  { %s2353_s27 = smov 0   ;;  %s2355_s28 = smov 0  }
  0x12 LB: > { %2989 = sst [smem:[#allocation21_spill]] %s2267_s0  ;;  %s2392_s29 = sadd.s32 4294967295, %s2291_s28   ;;  %s2291_s28 = sphi %s2355_s28, %s27_s28   ;;  %s2287_s27 = sphi %s2353_s27, %s3037_s27   ;;  %s2283_s26 = sphi %s2351_s26, %s3036_s26   ;;  %s2279_s25 = sphi %s2349_s25, %s3028_s25   ;;  %s2275_s24 = sphi %s2347_s24, %s3035_s24   ;;  %s2271_s23 = sphi %s2345_s23, %s3034_s23   ;;  %s2267_s0 = sphi %s2343_s0, %s3026_s0   ;;  %s2263_s22 = sphi %s2341_s22, %s3033_s22   ;;  %s2259_s21 = sphi %s2339_s21, %s3032_s21   ;;  %s2255_s20 = sphi %s2337_s20, %s3031_s20   ;;  %s2251_s19 = sphi %s2335_s19, %s3030_s19   ;;  %s2247_s18 = sphi %s2333_s18, %s3029_s18  }
  0x13   : > { %2990 = sst [smem:[#allocation22_spill]] %s2279_s25  ;;  %s39_s30 = sadd.s32 1, %s2287_s27 }
  0x14   : > { %p41_p0 = scmp.ge.s32.totalorder %s39_s30, 2  ;;  %p2978_p1 = scmp.eq.s32.totalorder %s2291_s28, 0 }
  0x15   : > { %p2977_p2 = scmp.eq.s32.totalorder %s2392_s29, 0  ;;  %s69_s5 = sld [smem:[#allocation4 + %s2287_s27]] }
  0x16   : > { %s3039_s30 = smov (%p41_p0, %s39_s30), 0  ;;  %s76_s6 = sadd.s32 1, %s2267_s0 }
  0x17   : > { %p83_p3 = scmp.ne.s32.totalorder %s2267_s0, %s2263_s22  ;;  %s70_s7 = sld [smem:[#allocation4 + %s3039_s30]] }
  0x18   : > { %p89_p4 = scmp.ne.s32.totalorder %s2263_s22, %s2259_s21  ;;  %p2976_p8 = scmp.lt.s32.totalorder %s2291_s28, 2 }
  0x19   : > { %p2407_p5 = por %p83_p3, %p2978_p1  ;;  %s190_s10 = sand.u32 1, %s2291_s28  }
  0x1a   : > { %p2414_p7 = por %p89_p4, %p2977_p2  ;;  %s192_s11 = sand.u32 1, %s2267_s0  }
  0x1b   : > { %s1537_s12 = sshll.u32 %s192_s11, 8  ;;  %p2425_p9 = pnand %p2976_p8, %p2407_p5 }
  0x1c   : > { %s2992_s9 = scalar_select %p2414_p7, 1, 0 }
  0x1d   : > { %s71_s14 = ssub.s32 %s69_s5, %s70_s7  ;;  %s194_s15 = scalar_lea.vmem [#allocation8], %s1537_s12 }
  0x1e   : > { %s204_s16 = sshll.u32 %s194_s15, 4  ;;  %p74_p10 = scmp.eq.s32.totalorder %s71_s14, 0  ;;  %s2429_s16 = int_to_ptr.vmem [resolvable:$true] %s204_s16 }
  0x1f   : > { %s1726_s17 = scalar_select %p2407_p5, [#allocation4], [#allocation12] }
  0x20   : > { %s2434_s21 = scalar_select %p74_p10, %s2267_s0, %s76_s6  }
  0x21   : > { %s1727_s11 = scalar_select %p2407_p5, %s2287_s27, 0 }
  0x22   : > { %2994 = sst [smem:[#allocation23_spill]] %s2434_s21  ;;  %s3041_s17 = smov (!%p2976_p8, %s1726_s17), [#allocation14] }
  0x23   : > { %s3043_s11 = smov (!%p2976_p8, %s1727_s11), 0  ;;  %p1543_p11 = scmp.ge.s32.totalorder %s2291_s28, 1 }
  0x24   : > { %s195_s4 = sld [smem:[%s3041_s17 + %s3043_s11]]  ;;  %p236_p12 = scmp.lt.s32.totalorder %s2291_s28, 3 }
  0x25   : > { %s2996_s2 = sld [smem:[#allocation26_spill]]  ;;  %s1531_s6 = sadd.s32 4294967294, %s2291_s28  }
  0x26   : > { %p2445_p13 = pnand %p1543_p11, %p236_p12  ;;  %s2455_s8 = scalar_lea.sflag [#allocation9], %s190_s10 }
  0x27   : > { %p2071_p3 = pneg %p2425_p9 }
  0x28   : > { %s2995_s5 = scalar_select %p2445_p13, 1, 0 }
  0x2a   : > { %s1642_s7 = sshll.u32 %s195_s4, 12 }
  0x2b   : > { %s2452_s15 = scalar_lea.hbm %s2996_s2, %s1642_s7  ;;  %s2074_s4 = scalar_lea.hbm %s2996_s2, 8192 }
  0x2c   : > { %s2069_s21 = scalar_lea.hbm %s2452_s15, 4096  ;;  %p2075_p10 = scmp.lt.s32.totalorder %s2452_s15, %s2996_s2 }
  0x2d   : > { %p2070_p0 = scmp.ne.s32.totalorder %s2452_s15, %s2069_s21  ;;  %p2076_p11 = scmp.lt.s32.totalorder %s2074_s4, %s2069_s21 }
  0x2f   : > { %p2072_p4 = pnand %p2071_p3, %p2070_p0  ;;  %p2077_p12 = por %p2076_p11, %p2075_p10 }
  0x31   : > { %p2073_p5 = pneg %p2072_p4 }
  0x33   : > { %p2078_p6 = pnand %p2077_p12, %p2073_p5 }
  0x35   : > { %2081 = shalt.err (!%p2078_p6)
}
  0x36   : > { %s2082_s10 = scalar_lea.vmem %s2429_s16, 4096  ;;  %s2294_s7 = smov [#allocation8]  }
  0x37   : > { %p2083_p8 = scmp.ne.s32.totalorder %s2429_s16, %s2082_s10  ;;  %s2087_s14 = sshll.u32 %s2294_s7, 4  ;;  %s2088_s14 = int_to_ptr.vmem [resolvable:$false] %s2087_s14 }
  0x38   : > { %s2089_s17 = scalar_lea.vmem %s2088_s14, 8192  ;;  %p2090_p4 = scmp.lt.s32.totalorder %s2429_s16, %s2088_s14 }
  0x39   : > { %p2085_p2 = pnand %p2083_p8, %p2071_p3  ;;  %p2091_p1 = scmp.lt.s32.totalorder %s2089_s17, %s2082_s10 }
  0x3b   : > { %p2086_p0 = pneg %p2085_p2  ;;  %p2092_p7 = por %p2091_p1, %p2090_p4 }
  0x3d   : > { %p2093_p13 = pnand %p2092_p7, %p2086_p0 }
  0x3f   : > { %2096 = shalt.err (!%p2093_p13)
}
  0x40   : > { %s2295_s0 = smov 256   ;;  %s2296_s21 = smov 16  }
  0x41   : > { %1745 = dma.hbm_to_vmem [thread:$0]  (!%p2425_p9), %s2452_s15, 4096, %s2429_s16, %s2455_s8, %s2295_s0, %s2295_s0, %s2296_s21  }
  0x42   : > { %s43_s11 = ssub.s32 %s2287_s27, %s3039_s30  ;;  %s46_s4 = sadd.s32 1, %s2279_s25 }
  0x43   : > { %p44_p1 = scmp.eq.s32.totalorder %s43_s11, 0  ;;  %p53_p2 = scmp.ne.s32.totalorder %s2279_s25, %s2275_s24 }
  0x44   : > { %p59_p6 = scmp.ne.s32.totalorder %s2275_s24, %s2271_s23  ;;  %p143_p7 = scmp.eq.s32.totalorder %s2392_s29, 1 }
  0x45   : > { %s2485_s12 = scalar_select %p44_p1, %s2279_s25, %s46_s4  }
  0x46   : > { %p2998_p8 = scmp.eq.s32.totalorder %s2291_s28, 0  ;;  %p2999_p3 = scmp.eq.s32.totalorder %s2392_s29, 0 }
  0x47   : > { %2997 = sst [smem:[#allocation24_spill]] %s2485_s12  ;;  %p2495_p10 = por %p143_p7, %p53_p2 }
  0x48   : > { %p55_p13 = por %p2998_p8, %p53_p2  ;;  %p2491_p5 = por %p2999_p3, %p59_p6 }
  0x49   : > { %s3001_s7 = scalar_select %p2495_p10, 1, 0 }
  0x4a   : > { %s3000_s10 = scalar_select %p2491_p5, 1, 0 }
  0x4b   : > { %p149_p9 = scmp.eq.s32.totalorder %s1531_s6, 1  ;;  %s169_s13 = sand.u32 1, %s2279_s25  }
  0x4c   : > { %s1641_s16 = sshll.u32 %s2287_s27, 10  ;;  %s1534_s14 = sshll.u32 %s169_s13, 6 }
  0x4d   : > { %p2503_p11 = por %p149_p9, %p59_p6  ;;  %s179_s21 = scalar_lea.hbm %s2970_s1, %s1641_s16 }
  0x4e   : > { %p3004_p12 = scmp.lt.s32.totalorder %s2291_s28, 2  ;;  %s173_s4 = scalar_lea.vmem [#allocation5], %s1534_s14 }
  0x4f   : > { %s3002_s15 = scalar_select %p2503_p11, 1, 0 }
  0x50   : > { %p2512_p0 = pnand %p3004_p12, %p55_p13  ;;  %s180_s2 = sshll.u32 %s173_s4, 4  ;;  %s181_s2 = int_to_ptr.vmem [resolvable:$true] %s180_s2 }
  0x51   : > { %3003 = sst [smem:[#allocation25_spill]] %s3002_s15  ;;  %s170_s6 = scalar_lea.sflag [#allocation6], %s169_s13 }
  0x52   : > { %p2099_p4 = pneg %p2512_p0  ;;  %s2110_s12 = scalar_lea.vmem %s181_s2, 1024 }
  0x53   : > { %p2111_p1 = scmp.ne.s32.totalorder %s181_s2, %s2110_s12  ;;  %s2297_s25 = smov [#allocation5]  }
  0x54   : > { %s2115_s15 = sshll.u32 %s2297_s25, 4  ;;  %s2116_s15 = int_to_ptr.vmem [resolvable:$false] %s2115_s15 }
  0x55   : > { %p2113_p2 = pnand %p2111_p1, %p2099_p4  ;;  %s2117_s16 = scalar_lea.vmem %s2116_s15, 2048 }
  0x56   : > { %p2118_p7 = scmp.lt.s32.totalorder %s181_s2, %s2116_s15  ;;  %p2119_p8 = scmp.lt.s32.totalorder %s2117_s16, %s2110_s12 }
  0x57   : > { %p2114_p6 = pneg %p2113_p2 }
  0x58   : > { %p2120_p13 = por %p2119_p8, %p2118_p7 }
  0x5a   : > { %p2121_p3 = pnand %p2120_p13, %p2114_p6 }
  0x5c   : > { %2124 = shalt.err (!%p2121_p3)
}
  0x5d   : > { %s2982_s17 = smov 64   ;;  %s2983_s25 = smov 4  }
  0x5e   : > { %1740 = dma.hbm_to_vmem [thread:$0]  (!%p2512_p0), %s179_s21, 1024, %s181_s2, %s170_s6, %s2982_s17, %s2982_s17, %s2983_s25  }
  0x5f   : > { %s99_s12 = sld [smem:[#allocation4 + %s2287_s27]]  ;;  %p113_p9 = scmp.ne.s32.totalorder %s2255_s20, %s2251_s19 }
  0x60   : > { %s100_s13 = sld [smem:[#allocation4 + %s3039_s30]]  ;;  %p119_p12 = scmp.ne.s32.totalorder %s2251_s19, %s2247_s18 }
  0x61   : > { %p3006_p4 = scmp.eq.s32.totalorder %s2392_s29, 0  ;;  %s216_s14 = sand.u32 1, %s2255_s20  }
  0x62   : > { %p3008_p2 = scmp.eq.s32.totalorder %s2291_s28, 0  ;;  %s106_s0 = sadd.s32 1, %s2255_s20 }
  0x63   : > { %p2531_p1 = por %p119_p12, %p3006_p4  ;;  %s1540_s4 = sshll.u32 %s216_s14, 7 }
  0x64   : > { %p115_p6 = por %p113_p9, %p3008_p2  ;;  %p3009_p8 = scmp.lt.s32.totalorder %s2291_s28, 2 }
  0x65   : > { %s3007_s15 = scalar_select %p2531_p1, 1, 0 }
  0x66   : > { %s101_s11 = ssub.s32 %s99_s12, %s100_s13  ;;  %p2541_p0 = pnand %p3009_p8, %p115_p6 }
  0x67   : > { %p104_p7 = scmp.eq.s32.totalorder %s101_s11, 0  ;;  %p3011_p13 = pmov %p3009_p8 }
  0x68   : > { %s1729_s21 = scalar_select %p115_p6, [#allocation4], [#allocation13] }
  0x69   : > { %s2546_s18 = scalar_select %p104_p7, %s2255_s20, %s106_s0  }
  0x6a   : > { %s1730_s6 = scalar_select %p115_p6, %s2287_s27, 0 }
  0x6b   : > { %s3045_s21 = smov (!%p3011_p13, %s1729_s21), [#allocation15]  ;;  %p3012_p3 = pmov %p3009_p8 }
  0x6c   : > { %s218_s17 = scalar_lea.vmem [#allocation10], %s1540_s4  ;;  %p2127_p12 = pneg %p2541_p0 }
  0x6d   : > { %s3047_s6 = smov (!%p3012_p3, %s1730_s6), 0  ;;  %s228_s25 = sshll.u32 %s218_s17, 4  ;;  %s2553_s25 = int_to_ptr.vmem [resolvable:$true] %s228_s25 }
  0x6e   : > { %s219_s16 = sld [smem:[%s3045_s21 + %s3047_s6]]  ;;  %s2130_s17 = scalar_lea.hbm %s2972_s3, 4096 }
  0x74   : > { %s1643_s12 = sshll.u32 %s219_s16, 11 }
  0x75   : > { %s2558_s11 = scalar_lea.hbm %s2972_s3, %s1643_s12 }
  0x76   : > { %s2125_s0 = scalar_lea.hbm %s2558_s11, 2048  ;;  %p2131_p6 = scmp.lt.s32.totalorder %s2558_s11, %s2972_s3 }
  0x77   : > { %p2126_p9 = scmp.ne.s32.totalorder %s2558_s11, %s2125_s0  ;;  %p2132_p7 = scmp.lt.s32.totalorder %s2130_s17, %s2125_s0 }
  0x79   : > { %p2128_p4 = pnand %p2127_p12, %p2126_p9  ;;  %p2133_p8 = por %p2132_p7, %p2131_p6 }
  0x7b   : > { %p2129_p2 = pneg %p2128_p4 }
  0x7d   : > { %p2134_p13 = pnand %p2133_p8, %p2129_p2 }
  0x7f   : > { %2137 = shalt.err (!%p2134_p13)
}
  0x80   : > { %s2138_s12 = scalar_lea.vmem %s2553_s25, 2048  ;;  %s2300_s13 = smov [#allocation10]  }
  0x81   : > { %p2139_p3 = scmp.ne.s32.totalorder %s2553_s25, %s2138_s12  ;;  %s2143_s14 = sshll.u32 %s2300_s13, 4  ;;  %s2144_s14 = int_to_ptr.vmem [resolvable:$false] %s2143_s14 }
  0x82   : > { %s2145_s21 = scalar_lea.vmem %s2144_s14, 4096  ;;  %p2146_p4 = scmp.lt.s32.totalorder %s2553_s25, %s2144_s14 }
  0x83   : > { %p2141_p11 = pnand %p2139_p3, %p2127_p12  ;;  %p2147_p10 = scmp.lt.s32.totalorder %s2145_s21, %s2138_s12 }
  0x85   : > { %p2142_p9 = pneg %p2141_p11  ;;  %p2148_p1 = por %p2147_p10, %p2146_p4 }
  0x87   : > { %p2149_p5 = pnand %p2148_p1, %p2142_p9 }
  0x89   : > { %2152 = shalt.err (!%p2149_p5)
}
  0x8a   : > { %s3013_s0 = smov 4   ;;  %s3014_s4 = smov 64  }
  0x8b   : > { %1750 = dma.hbm_to_vmem [thread:$0]  (!%p2541_p0), %s2558_s11, 2048, %s2553_s25, %s2455_s8, %s3014_s4, %s3014_s4, %s3013_s0  }
  0x8c   : > { %p3015_p11 = scmp.ne.s32.totalorder %s2995_s5, 0 }
  0x8d   : > { %s2585_s17 = sand.u32 (!%p3015_p11), 1, %s2275_s24   ;;  %p3016_p5 = scmp.ne.s32.totalorder (!%p3015_p11), %s3000_s10, 0 }
  0x8e   : > { %240 = sbr.rel (%p3015_p11) target bundleno = 716 (0x2cc), region = 32  ;;  %s1544_s6 = sshll.u32 (!%p3015_p11), %s2585_s17, 6 }
  0x8f   : > { %s243_s16 = scalar_lea.sflag (!%p3015_p11), [#allocation6], %s2585_s17  ;;  %s2589_s12 = scalar_lea.vmem (!%p3015_p11), [#allocation5], %s1544_s6 }
  0x93   : > { %2230 = dma.done.wait (%p3016_p5), %s243_s16, 1024  }
  0x94   : > { %2232 = vsyncadd (%p3016_p5), %s243_s16, 4294966272  ;;  %s251_s5 = sand.u32 1, %s2392_s29   ;;  %s253_s8 = sand.u32 1, %s2263_s22  }
  0x95   : > { %s1545_s25 = sshll.u32 %s253_s8, 8  ;;  %s252_s2 = scalar_lea.sflag [#allocation9], %s251_s5 }
  0x96   : > { %s2597_s11 = scalar_lea.vmem [#allocation8], %s1545_s25  ;;  %p3017_p10 = scmp.ne.s32.totalorder %s2992_s9, 0 }
  0x98   : > { %2234 = dma.done.wait (%p3017_p10), %s252_s2, 4096  }
  0x99   : > { %2236 = vsyncadd (%p3017_p10), %s252_s2, 4294963200  ;;  %s262_s13 = sand.u32 1, %s2251_s19   ;;  %p3018_p1 = scmp.ne.s32.totalorder %s3007_s15, 0 }
  0x9a   : > { %s1546_s14 = sshll.u32 %s262_s13, 7 }
  0x9b   : > { %s2604_s10 = scalar_lea.vmem [#allocation10], %s1546_s14 }
  0x9c   : > { %2238 = dma.done.wait (%p3018_p1), %s252_s2, 2048  }
  0x9d   : > { %2240 = vsyncadd (%p3018_p1), %s252_s2, 4294965248  ;;  %v2301_v0 = vmov 0   ;;  %v1861_v1 = vld [vmem:[%s2597_s11 + $0xe4] ss:$16 sps:$4 sm:$0xff]   ;;  %v1863_v2 = vld [vmem:[%s2597_s11 + $0xe0] ss:$16 sps:$4 sm:$0xff]  }
  0x9e   : > { %612 = vmatprep.mubr.bf16.mxu0 %v2301_v0  ;;  %652 = vmatprep.mubr.bf16.mxu1 %v2301_v0  ;;  %v1864_v3 = vld [vmem:[%s2597_s11 + $0xc4] ss:$16 sps:$4 sm:$0xff]   ;;  %v1866_v4 = vld [vmem:[%s2597_s11 + $0xc0] ss:$16 sps:$4 sm:$0xff]   ;;  %v1889_v19 = vld [vmem:[%s2597_s11 + $0xec] ss:$16 sps:$4 sm:$0xff]  }
  0x9f   : > { %580 = vmatprep.subr.bf16.mxu0 %v1861_v1  ;;  %1709 = vmatprep.subr.bf16.mxu1 %v1861_v1  ;;  %v1867_v5 = vld [vmem:[%s2597_s11 + $0xa4] ss:$16 sps:$4 sm:$0xff]   ;;  %v1869_v6 = vld [vmem:[%s2597_s11 + $0xa0] ss:$16 sps:$4 sm:$0xff]   ;;  %v1887_v20 = vld [vmem:[%s2597_s11 + $0xe8] ss:$16 sps:$4 sm:$0xff]  }
  0xa0   : > { %581 = vmatpush1.bf16.msra.mxu0 %v1863_v2  ;;  %1717 = vmatpush1.bf16.msra.mxu1 %v1863_v2  ;;  %v1870_v7 = vld [vmem:[%s2597_s11 + $0x84] ss:$16 sps:$4 sm:$0xff]   ;;  %v1872_v8 = vld [vmem:[%s2597_s11 + $0x80] ss:$16 sps:$4 sm:$0xff]   ;;  %v1892_v21 = vld [vmem:[%s2597_s11 + $0xcc] ss:$16 sps:$4 sm:$0xff]  }
  0xa1   : > { %582 = vmatprep.subr.bf16.mxu0 %v1864_v3  ;;  %1710 = vmatprep.subr.bf16.mxu1 %v1864_v3  ;;  %v1873_v9 = vld [vmem:[%s2597_s11 + $0x64] ss:$16 sps:$4 sm:$0xff]   ;;  %v1875_v10 = vld [vmem:[%s2597_s11 + $0x60] ss:$16 sps:$4 sm:$0xff]   ;;  %v1890_v22 = vld [vmem:[%s2597_s11 + $0xc8] ss:$16 sps:$4 sm:$0xff]  }
  0xa2   : > { %v1876_v11 = vld [vmem:[%s2597_s11 + $0x44] ss:$16 sps:$4 sm:$0xff]   ;;  %v1878_v12 = vld [vmem:[%s2597_s11 + $0x40] ss:$16 sps:$4 sm:$0xff]   ;;  %v1897_v23 = vld [vmem:[%s2597_s11 + $0xac] ss:$16 sps:$4 sm:$0xff]  }
  0xa3   : > { %v1879_v13 = vld [vmem:[%s2597_s11 + $0x24] ss:$16 sps:$4 sm:$0xff]   ;;  %v1881_v14 = vld [vmem:[%s2597_s11 + $0x20] ss:$16 sps:$4 sm:$0xff]   ;;  %v1893_v24 = vld [vmem:[%s2589_s12 + $0x8] sm:$0xff]   ;;  %s1547_s29 = sshll.u32 %s2585_s17, 7 }
  0xa4   : > { %583 = vmatpush1.bf16.msra.mxu0 %v1866_v4  ;;  %1718 = vmatpush1.bf16.msra.mxu1 %v1866_v4  ;;  %v1882_v15 = vld [vmem:[%s2597_s11 + $0x4] ss:$16 sps:$4 sm:$0xff]   ;;  %v1884_v16 = vld [vmem:[%s2597_s11] ss:$16 sps:$4 sm:$0xff]   ;;  %v1894_v25 = vld [vmem:[%s2589_s12 + $0x28] sm:$0xff]   ;;  %s2878_s9 = scalar_lea.vmem [#allocation11], %s1547_s29 }
  0xa5   : > { %584 = vmatprep.subr.bf16.mxu0 %v1867_v5  ;;  %1711 = vmatprep.subr.bf16.mxu1 %v1867_v5  ;;  %v1885_v17 = vld [vmem:[%s2589_s12] sm:$0xff]   ;;  %v1895_v26 = vld [vmem:[%s2597_s11 + $0xa8] ss:$16 sps:$4 sm:$0xff]   ;;  %v1900_v27 = vld [vmem:[%s2597_s11 + $0x8c] ss:$16 sps:$4 sm:$0xff]   ;;  %s1644_s15 = sshll.u32 %s2283_s26, 11 }
  0xa6   : > { %v2630_v18 = vld [vmem:[%s2589_s12 + $0x20] sm:$0xff]   ;;  %v1898_v28 = vld [vmem:[%s2597_s11 + $0x88] ss:$16 sps:$4 sm:$0xff]   ;;  %v1905_v29 = vld [vmem:[%s2597_s11 + $0x6c] ss:$16 sps:$4 sm:$0xff]   ;;  %s1400_s21 = sshll.u32 %s2878_s9, 4  ;;  %s2902_s21 = int_to_ptr.vmem [resolvable:$true] %s1400_s21 }
  0xa7   : > { %v1901_v30 = vld [vmem:[%s2589_s12 + $0x10] sm:$0xff]   ;;  %v1903_v32 = vld [vmem:[%s2597_s11 + $0x68] ss:$16 sps:$4 sm:$0xff]   ;;  %v1908_v33 = vld [vmem:[%s2597_s11 + $0x4c] ss:$16 sps:$4 sm:$0xff]   ;;  %s3019_s6 = sld [smem:[#allocation27_spill]] }
  0xa8   : > { %585 = vmatpush1.bf16.msra.mxu0 %v1869_v6  ;;  %1719 = vmatpush1.bf16.msra.mxu1 %v1869_v6  ;;  %v1902_v31 = vld [vmem:[%s2589_s12 + $0x30] sm:$0xff]   ;;  %v1906_v34 = vld [vmem:[%s2597_s11 + $0x48] ss:$16 sps:$4 sm:$0xff]   ;;  %v1913_v35 = vld [vmem:[%s2597_s11 + $0x2c] ss:$16 sps:$4 sm:$0xff]   ;;  %s2153_s5 = scalar_lea.vmem %s2902_s21, 2048 }
  0xa9   : > { %586 = vmatprep.subr.bf16.mxu0 %v1870_v7  ;;  %1712 = vmatprep.subr.bf16.mxu1 %v1870_v7  ;;  %v1909_v36 = vld [vmem:[%s2589_s12 + $0x18] sm:$0xff]   ;;  %v1919_v43 = vld [vmem:[%s2604_s10 + $0x70] sm:$0xff]   ;;  %v1921_v45 = vld [vmem:[%s2604_s10 + $0x68] sm:$0xff]   ;;  %p2154_p0 = scmp.ne.s32.totalorder %s2902_s21, %s2153_s5  ;;  %p3020_p12 = scmp.ne.s32.totalorder %s3001_s7, 0 }
  0xaa   : > { %v1910_v37 = vld [vmem:[%s2589_s12 + $0x38] sm:$0xff]   ;;  %v1920_v44 = vld [vmem:[%s2604_s10 + $0x30] sm:$0xff]   ;;  %v1922_v46 = vld [vmem:[%s2604_s10 + $0x28] sm:$0xff]   ;;  %s1387_s12 = scalar_lea.sflag [#allocation7], %s2585_s17  ;;  %s2302_s26 = smov [#allocation11]  }
  0xab   : > { %v1911_v38 = vld [vmem:[%s2597_s11 + $0x28] ss:$16 sps:$4 sm:$0xff]   ;;  %v1916_v39 = vld [vmem:[%s2597_s11 + $0xc] ss:$16 sps:$4 sm:$0xff]   ;;  %v1923_v47 = vld [vmem:[%s2604_s10 + $0x60] sm:$0xff]   ;;  %p2155_p2 = pnand %p2154_p0, %p3020_p12  ;;  %s2157_s8 = sshll.u32 %s2302_s26, 4  ;;  %s2158_s8 = int_to_ptr.vmem [resolvable:$false] %s2157_s8 }
  0xac   : > { %587 = vmatpush1.bf16.msra.mxu0 %v1872_v8  ;;  %1720 = vmatpush1.bf16.msra.mxu1 %v1872_v8  ;;  %v1914_v40 = vld [vmem:[%s2597_s11 + $0x8] ss:$16 sps:$4 sm:$0xff]   ;;  %v1924_v48 = vld [vmem:[%s2604_s10 + $0x20] sm:$0xff]   ;;  %v1927_v51 = vld [vmem:[%s2604_s10 + $0x50] sm:$0xff]   ;;  %s2159_s25 = scalar_lea.vmem %s2158_s8, 4096  ;;  %p2160_p7 = scmp.lt.s32.totalorder %s2902_s21, %s2158_s8 }
  0xad   : > { %588 = vmatprep.subr.bf16.mxu0 %v1873_v9  ;;  %1713 = vmatprep.subr.bf16.mxu1 %v1873_v9  ;;  %v1917_v41 = vld [vmem:[%s2604_s10 + $0x78] sm:$0xff]   ;;  %v1928_v52 = vld [vmem:[%s2604_s10 + $0x10] sm:$0xff]   ;;  %v1929_v53 = vld [vmem:[%s2604_s10 + $0x48] sm:$0xff]   ;;  %s2900_s16 = scalar_lea.hbm %s3019_s6, %s1644_s15  ;;  %p2156_p6 = pneg %p2155_p2 }
  0xae   : > { %v1918_v42 = vld [vmem:[%s2604_s10 + $0x38] sm:$0xff]   ;;  %v1930_v54 = vld [vmem:[%s2604_s10 + $0x8] sm:$0xff]   ;;  %v1931_v55 = vld [vmem:[%s2604_s10 + $0x40] sm:$0xff]   ;;  %p2161_p8 = scmp.lt.s32.totalorder %s2159_s25, %s2153_s5 }
  0xaf   : > { %v1925_v49 = vld [vmem:[%s2604_s10 + $0x58] sm:$0xff]   ;;  %v1932_v56 = vld [vmem:[%s2604_s10] sm:$0xff]  }
  0xb0   : > { %589 = vmatpush1.bf16.msra.mxu0 %v1875_v10  ;;  %1721 = vmatpush1.bf16.msra.mxu1 %v1875_v10  ;;  %v1926_v50 = vld [vmem:[%s2604_s10 + $0x18] sm:$0xff]   ;;  %p2162_p13 = por %p2161_p8, %p2160_p7 }
  0xb1   : > { %590 = vmatprep.subr.bf16.mxu0 %v1876_v11  ;;  %1714 = vmatprep.subr.bf16.mxu1 %v1876_v11 }
  0xb2   : > { %p2163_p3 = pnand %p2162_p13, %p2156_p6 }
  0xb4   : > { %591 = vmatpush1.bf16.msra.mxu0 %v1878_v12  ;;  %1722 = vmatpush1.bf16.msra.mxu1 %v1878_v12 }
  0xb5   : > { %592 = vmatprep.subr.bf16.mxu0 %v1879_v13  ;;  %1715 = vmatprep.subr.bf16.mxu1 %v1879_v13 }
  0xb8   : > { %593 = vmatpush1.bf16.msra.mxu0 %v1881_v14  ;;  %1723 = vmatpush1.bf16.msra.mxu1 %v1881_v14 }
  0xb9   : > { %594 = vmatprep.subr.bf16.mxu0 %v1882_v15  ;;  %1716 = vmatprep.subr.bf16.mxu1 %v1882_v15 }
  0xbc   : > { %595 = vmatpush1.bf16.msra.mxu0 %v1884_v16  ;;  %1724 = vmatpush1.bf16.msra.mxu1 %v1884_v16 }
  0xbd   : > { %693 = vmatprep.subr.bf16.mxu1 %v1889_v19  ;;  %1645 = vmatprep.subr.bf16.mxu0 %v1917_v41 }
  0xbf   : > { %613 = vmatmul.mubr.bf16.vlgmr.msra.gmra.mxu0 %v1885_v17  ;;  %653 = vmatmul.mubr.bf16.vlgmr.msra.gmra.mxu1 %v2630_v18 }
  0xc0   : > { %694 = vmatpush1.bf16.msra.mxu1 %v1887_v20  ;;  %622 = vmatprep.mubr.bf16.mxu0 %v2301_v0 }
  0xc1   : > { %695 = vmatprep.subr.bf16.mxu1 %v1892_v21  ;;  %662 = vmatprep.mubr.bf16.mxu1 %v2301_v0 }
  0xc2   : > { %1646 = vmatpush3.bf16.msra.mxu0 %v1918_v42 }
  0xc3   : > { %1647 = vmatprep.subr.bf16.mxu0 %v1919_v43 }
  0xc4   : > { %696 = vmatpush1.bf16.msra.mxu1 %v1890_v22 }
  0xc5   : > { %697 = vmatprep.subr.bf16.mxu1 %v1897_v23 }
  0xc6   : > { %1648 = vmatpush3.bf16.msra.mxu0 %v1920_v44 }
  0xc7   : > { %623 = vmatmul.mubr.bf16.gmra.mxu0 %v1893_v24  ;;  %663 = vmatmul.mubr.bf16.gmra.mxu1 %v1894_v25 }
  0xc8   : > { %698 = vmatpush1.bf16.msra.mxu1 %v1895_v26  ;;  %632 = vmatprep.mubr.bf16.mxu0 %v2301_v0 }
  0xc9   : > { %699 = vmatprep.subr.bf16.mxu1 %v1900_v27  ;;  %672 = vmatprep.mubr.bf16.mxu1 %v2301_v0 }
  0xca   : > { %1649 = vmatprep.subr.bf16.mxu0 %v1921_v45 }
  0xcb   : > { %1650 = vmatpush3.bf16.msra.mxu0 %v1922_v46 }
  0xcc   : > { %700 = vmatpush1.bf16.msra.mxu1 %v1898_v28  ;;  %1651 = vmatprep.subr.bf16.mxu0 %v1923_v47 }
  0xcd   : > { %701 = vmatprep.subr.bf16.mxu1 %v1905_v29 }
  0xcf   : > { %633 = vmatmul.mubr.bf16.gmra.mxu0 %v1901_v30  ;;  %673 = vmatmul.mubr.bf16.gmra.mxu1 %v1902_v31 }
  0xd0   : > { %702 = vmatpush1.bf16.msra.mxu1 %v1903_v32  ;;  %642 = vmatprep.mubr.bf16.mxu0 %v2301_v0 }
  0xd1   : > { %703 = vmatprep.subr.bf16.mxu1 %v1908_v33  ;;  %682 = vmatprep.mubr.bf16.mxu1 %v2301_v0 }
  0xd2   : > { %1652 = vmatpush3.bf16.msra.mxu0 %v1924_v48 }
  0xd3   : > { %1653 = vmatprep.subr.bf16.mxu0 %v1925_v49 }
  0xd4   : > { %704 = vmatpush1.bf16.msra.mxu1 %v1906_v34 }
  0xd5   : > { %705 = vmatprep.subr.bf16.mxu1 %v1913_v35 }
  0xd6   : > { %1654 = vmatpush3.bf16.msra.mxu0 %v1926_v50 }
  0xd7   : > { %643 = vmatmul.mubr.bf16.gmra.mxu0 %v1909_v36  ;;  %683 = vmatmul.mubr.bf16.gmra.mxu1 %v1910_v37 }
  0xd8   : > { %706 = vmatpush1.bf16.msra.mxu1 %v1911_v38  ;;  %725 = vmatprep.mubr.bf16.mxu1 %v2301_v0 }
  0xd9   : > { %707 = vmatprep.subr.bf16.mxu1 %v1916_v39  ;;  %1655 = vmatprep.subr.bf16.mxu0 %v1927_v51 }
  0xda   : > { %1656 = vmatpush3.bf16.msra.mxu0 %v1928_v52 }
  0xdb   : > { %1657 = vmatprep.subr.bf16.mxu0 %v1929_v53 }
  0xdc   : > { %708 = vmatpush1.bf16.msra.mxu1 %v1914_v40 }
  0xde   : > { %1658 = vmatpush3.bf16.msra.mxu0 %v1930_v54 }
  0xdf   : > { %726 = vmatmul.mubr.bf16.vlgmr.msra.gmra.mxu1 %v1885_v17  ;;  %1659 = vmatprep.subr.bf16.mxu0 %v1931_v55 }
  0xe0   : > { %735 = vmatprep.mubr.bf16.mxu1 %v2301_v0 }
  0xe2   : > { %1660 = vmatpush3.bf16.msra.mxu0 %v1932_v56 }
  0xe7   : > { %736 = vmatmul.mubr.bf16.gmra.mxu1 %v1893_v24 }
  0xe8   : > { %745 = vmatprep.mubr.bf16.mxu1 %v2301_v0 }
  0xef   : > { %746 = vmatmul.mubr.bf16.gmra.mxu1 %v1901_v30 }
  0xf0   : > { %755 = vmatprep.mubr.bf16.mxu1 %v2301_v0 }
  0xf7   : > { %756 = vmatmul.mubr.bf16.gmra.mxu1 %v1909_v36 }
  0xf8   : > { %765 = vmatprep.mubr.bf16.mxu1 %v2301_v0 }
  0xff   : > { %766 = vmatmul.mubr.bf16.gmra.mxu1 %v2630_v18 }
 0x100   : > { %775 = vmatprep.mubr.bf16.mxu1 %v2301_v0 }
 0x107   : > { %776 = vmatmul.mubr.bf16.gmra.mxu1 %v1894_v25 }
 0x108   : > { %785 = vmatprep.mubr.bf16.mxu1 %v2301_v0 }
 0x10f   : > { %786 = vmatmul.mubr.bf16.gmra.mxu1 %v1902_v31 }
 0x110   : > { %795 = vmatprep.mubr.bf16.mxu1 %v2301_v0 }
 0x117   : > { %796 = vmatmul.mubr.bf16.gmra.mxu1 %v1910_v37 }
 0x17f   : > { %v2686_v57 = vpop.f32.mrf.mxu0  ;;  %v2688_v58 = vpop.f32.mrf.mxu1 }
 0x180   : > { %v1588_v59 = vmul.f32 -1.442695, %v2686_v57  ;;  %v1604_v5 = vmul.f32 -1.442695, %v2688_v58 }
 0x181   : > { %v2691_v60 = vpop.f32.mrf.mxu0  ;;  %v2693_v61 = vpop.f32.mrf.mxu1 }
 0x182   : > { %1933 = vpow2.f32 %v1588_v59  ;;  %v1589_v62 = vmul.f32 -1.442695, %v2691_v60  ;;  %v1605_v9 = vmul.f32 -1.442695, %v2693_v61 }
 0x183   : > { %v2696_v63 = vpop.f32.mrf.mxu0  ;;  %v2698_v0 = vpop.f32.mrf.mxu1 }
 0x184   : > { %1935 = vpow2.f32 %v1589_v62  ;;  %v1590_v1 = vmul.f32 -1.442695, %v2696_v63  ;;  %v1606_v13 = vmul.f32 -1.442695, %v2698_v0 }
 0x185   : > { %v2701_v2 = vpop.f32.mrf.mxu0  ;;  %v2703_v3 = vpop.f32.mrf.mxu1 }
 0x186   : > { %1937 = vpow2.f32 %v1590_v1  ;;  %v1591_v4 = vmul.f32 -1.442695, %v2701_v2  ;;  %v1607_v17 = vmul.f32 -1.442695, %v2703_v3 }
 0x187   : > { %v2707_v6 = vpop.f32.mrf.mxu0  ;;  %v2709_v7 = vpop.f32.mrf.mxu1 }
 0x188   : > { %1939 = vpow2.f32 %v1591_v4  ;;  %v1592_v8 = vmul.f32 -1.442695, %v2707_v6  ;;  %v1608_v22 = vmul.f32 -1.442695, %v2709_v7 }
 0x189   : > { %v2713_v10 = vpop.f32.mrf.mxu0  ;;  %v2715_v11 = vpop.f32.mrf.mxu1 }
 0x18a   : > { %1941 = vpow2.f32 %v1592_v8  ;;  %v1593_v12 = vmul.f32 -1.442695, %v2713_v10  ;;  %v1609_v34 = vmul.f32 -1.442695, %v2715_v11 }
 0x18b   : > { %1943 = vpow2.f32 %v1604_v5  ;;  %v2719_v14 = vpop.f32.mrf.mxu0  ;;  %v2721_v15 = vpop.f32.mrf.mxu1 }
 0x18c   : > { %1945 = vpow2.f32 %v1593_v12  ;;  %v1594_v16 = vmul.f32 -1.442695, %v2719_v14  ;;  %v1610_v38 = vmul.f32 -1.442695, %v2721_v15 }
 0x18d   : > { %1947 = vpow2.f32 %v1605_v9  ;;  %v2725_v18 = vpop.f32.mrf.mxu0  ;;  %v2727_v19 = vpop.f32.mrf.mxu1 }
 0x18e   : > { %1949 = vpow2.f32 %v1594_v16  ;;  %v1595_v20 = vmul.f32 -1.442695, %v2725_v18  ;;  %v1611_v40 = vmul.f32 -1.442695, %v2727_v19 }
 0x18f   : > { %v1934_v21 = vpop.eup %1933  ;;  %1951 = vpow2.f32 %v1606_v13  ;;  %v2731_v23 = vpop.f32.mrf.mxu0 }
 0x190   : > { %v2733_v24 = vpop.f32.mrf.mxu1  ;;  %1953 = vpow2.f32 %v1595_v20  ;;  %v902_v26 = vadd.f32 1.0, %v1934_v21  ;;  %v1596_v4 = vmul.f32 -1.442695, %v2731_v23 }
 0x191   : > { %v1936_v25 = vpop.eup %1935  ;;  %1955 = vpow2.f32 %v1607_v17  ;;  %v2735_v27 = vpop.f32.mrf.mxu0 }
 0x192   : > { %v2737_v28 = vpop.f32.mrf.mxu1  ;;  %v903_v29 = vadd.f32 1.0, %v1936_v25  ;;  %1957 = vpow2.f32 %v1608_v22  ;;  %v1597_v12 = vmul.f32 -1.442695, %v2735_v27 }
 0x193   : > { %v1938_v30 = vpop.eup %1937  ;;  %v2742_v35 = vpop.f32.mrf.mxu0 }
 0x194   : > { %v2739_v31 = vpop.f32.mrf.mxu1  ;;  %1959 = vrcp.f32 %v903_v29  ;;  %v904_v32 = vadd.f32 1.0, %v1938_v30  ;;  %v1598_v22 = vmul.f32 -1.442695, %v2742_v35 }
 0x195   : > { %v1940_v33 = vpop.eup %1939  ;;  %1961 = vrcp.f32 %v902_v26  ;;  %v2750_v45 = vpop.f32.mrf.mxu0 }
 0x196   : > { %v2744_v36 = vpop.f32.mrf.mxu1  ;;  %1963 = vrcp.f32 %v904_v32  ;;  %v905_v37 = vadd.f32 1.0, %v1940_v33  ;;  %v1599_v33 = vmul.f32 -1.442695, %v2750_v45 }
 0x197   : > { %v1942_v39 = vpop.eup %1941  ;;  %v2756_v56 = vpop.f32.mrf.mxu0 }
 0x198   : > { %v2748_v41 = vpop.f32.mrf.mxu1  ;;  %v1944_v42 = vpop.eup %1943  ;;  %1965 = vrcp.f32 %v905_v37  ;;  %v906_v44 = vadd.f32 1.0, %v1942_v39 }
 0x199   : > { %v1946_v43 = vpop.eup %1945  ;;  %1967 = vpow2.f32 %v1609_v34  ;;  %v918_v50 = vadd.f32 1.0, %v1944_v42  ;;  %v2762_v17 = vpop.f32.mrf.mxu0 }
 0x19a   : > { %v2752_v46 = vpop.f32.mrf.mxu1  ;;  %v1948_v47 = vpop.eup %1947  ;;  %v907_v48 = vadd.f32 1.0, %v1946_v43  ;;  %1969 = vpow2.f32 %v1610_v38  ;;  %v1612_v38 = vmul.f32 -1.442695, %v2733_v24 }
 0x19b   : > { %v1950_v49 = vpop.eup %1949  ;;  %1971 = vpow2.f32 %v1611_v40  ;;  %v919_v55 = vadd.f32 1.0, %v1948_v47  ;;  %v2770_v39 = vpop.f32.mrf.mxu0 }
 0x19c   : > { %v2754_v51 = vpop.f32.mrf.mxu1  ;;  %v1952_v52 = vpop.eup %1951  ;;  %1973 = vrcp.f32 %v907_v48  ;;  %v908_v53 = vadd.f32 1.0, %v1950_v49  ;;  %v1601_v49 = vmul.f32 -1.442695, %v2762_v17 }
 0x19d   : > { %v1954_v54 = vpop.eup %1953  ;;  %1975 = vrcp.f32 %v906_v44  ;;  %v920_v5 = vadd.f32 1.0, %v1952_v52  ;;  %v1613_v44 = vmul.f32 -1.442695, %v2737_v28 }
 0x19e   : > { %v2758_v59 = vpop.f32.mrf.mxu1  ;;  %v1956_v62 = vpop.eup %1955  ;;  %1977 = vrcp.f32 %v908_v53  ;;  %v909_v1 = vadd.f32 1.0, %v1954_v54 }
 0x19f   : > { %1979 = vrcp.f32 %v918_v50  ;;  %v1958_v9 = vpop.eup %1957  ;;  %v921_v16 = vadd.f32 1.0, %v1956_v62  ;;  %v2783_v54 = vpop.f32.mrf.mxu0 }
 0x1a0   : > { %v727_v8 = vpop.f32.mrf.mxu1  ;;  %1981 = vrcp.f32 %v909_v1  ;;  %v922_v26 = vadd.f32 1.0, %v1958_v9 }
 0x1a1   : > { %v1960_v13 = vpop.eup %1959  ;;  %1983 = vrcp.f32 %v919_v55 }
 0x1a2   : > { %v729_v20 = vpop.f32.mrf.mxu1  ;;  %v1962_v21 = vpop.eup %1961  ;;  %1985 = vpow2.f32 %v1596_v4  ;;  %v999_v30 = vmul.f32 %v1960_v13, %v2691_v60  ;;  %v1600_v60 = vmul.f32 -1.442695, %v2756_v56  ;;  %v1602_v4 = vmul.f32 -1.442695, %v2770_v39 }
 0x1a3   : > { %v1964_v25 = vpop.eup %1963  ;;  %1987 = vrcp.f32 %v920_v5  ;;  %v998_v37 = vmul.f32 %v1962_v21, %v2686_v57 }
 0x1a4   : > { %v731_v29 = vpop.f32.mrf.mxu1  ;;  %v1000_v32 = vmul.f32 %v1964_v25, %v2696_v63  ;;  %1989 = vpow2.f32 %v1597_v12  ;;  %v1031_v50 = vmul.f32 %v999_v30, %v729_v20  ;;  %v1615_v12 = vmul.f32 -1.442695, %v2744_v36 }
 0x1a5   : > { %v1966_v34 = vpop.eup %1965  ;;  %1991 = vrcp.f32 %v921_v16  ;;  %v1030_v55 = vmul.f32 %v998_v37, %v727_v8  ;;  %v1603_v8 = vmul.f32 -1.442695, %v2783_v54 }
 0x1a6   : > { %v733_v40 = vpop.f32.mrf.mxu1  ;;  %v2772_v42 = vpop.eup %1967  ;;  %v1001_v43 = vmul.f32 %v1966_v34, %v2701_v2  ;;  %1993 = vpow2.f32 %v1598_v22  ;;  %v1032_v47 = vmul.f32 %v1000_v32, %v731_v29  ;;  %v1614_v2 = vmul.f32 -1.442695, %v2739_v31 }
 0x1a7   : > { %v2776_v63 = vpop.eup %1969  ;;  %1995 = vrcp.f32 %v922_v26  ;;  %v1616_v29 = vmul.f32 -1.442695, %v2748_v41  ;;  %v1618_v34 = vmul.f32 -1.442695, %v2754_v51 }
 0x1a8   : > { %v737_v57 = vpop.f32.mrf.mxu1  ;;  %v2779_v48 = vpop.eup %1971  ;;  %1997 = vpow2.f32 %v1599_v33  ;;  %v1033_v52 = vmul.f32 %v1001_v43, %v733_v40  ;;  %v1078_v13 = vpack.c.bf16 %v1032_v47, %v1030_v55 }
 0x1a9   : > { %v1974_v53 = vpop.eup %1973  ;;  %1999 = vpow2.f32 %v1612_v38 }
 0x1aa   : > { %v739_v62 = vpop.f32.mrf.mxu1  ;;  %v1976_v1 = vpop.eup %1975  ;;  %2001 = vpow2.f32 %v1600_v60  ;;  %v1079_v5 = vpack.c.bf16 %v1033_v52, %v1031_v50  ;;  %v1003_v21 = vmul.f32 %v1974_v53, %v2713_v10  ;;  %v1617_v10 = vmul.f32 -1.442695, %v2752_v46 }
 0x1ab   : > { %v1978_v9 = vpop.eup %1977  ;;  %2003 = vpow2.f32 %v1613_v44  ;;  %v1002_v26 = vmul.f32 %v1976_v1, %v2707_v6 }
 0x1ac   : > { %v741_v16 = vpop.f32.mrf.mxu1  ;;  %v2787_v20 = vpop.eup %1979  ;;  %v1004_v22 = vmul.f32 %v1978_v9, %v2719_v14  ;;  %2005 = vpow2.f32 %v1601_v49  ;;  %1254 = vmatprep.mubr.bf16.mxu0 %v1079_v5  ;;  %v1035_v40 = vmul.f32 %v1003_v21, %v739_v62  ;;  %v923_v5 = vadd.f32 1.0, %v2772_v42 }
 0x1ad   : > { %v1982_v25 = vpop.eup %1981  ;;  %2007 = vpow2.f32 %v1614_v2  ;;  %1255 = vmatmul.mubr.bf16.vlgmr.msra.gmra.mxu0 %v1078_v13  ;;  %v1034_v47 = vmul.f32 %v1002_v26, %v737_v57  ;;  %v1619_v2 = vmul.f32 -1.442695, %v2758_v59  ;;  %v924_v13 = vadd.f32 1.0, %v2776_v63 }
 0x1ae   : > { %v743_v30 = vpop.f32.mrf.mxu1  ;;  %v2794_v32 = vpop.eup %1983  ;;  %v1005_v33 = vmul.f32 %v1982_v25, %v2725_v18  ;;  %2009 = vpow2.f32 %v1602_v4  ;;  %v1036_v37 = vmul.f32 %v1004_v22, %v741_v16  ;;  %v925_v22 = vadd.f32 1.0, %v2779_v48 }
 0x1af   : > { %v1986_v14 = vpop.eup %1985  ;;  %2011 = vpow2.f32 %v1615_v12 }
 0x1b0   : > { %v2799_v38 = vpop.f32.mrf.mxu1  ;;  %v2801_v6 = vpop.eup %1987  ;;  %2013 = vpow2.f32 %v1603_v8  ;;  %v1037_v43 = vmul.f32 %v1005_v33, %v743_v30  ;;  %v910_v44 = vadd.f32 1.0, %v1986_v14  ;;  %v1080_v55 = vpack.c.bf16 %v1036_v37, %v1034_v47 }
 0x1b1   : > { %v1990_v60 = vpop.eup %1989  ;;  %2015 = vpow2.f32 %v1616_v29 }
 0x1b2   : > { %v2803_v18 = vpop.f32.mrf.mxu1  ;;  %v2805_v49 = vpop.eup %1991  ;;  %v911_v50 = vadd.f32 1.0, %v1990_v60  ;;  %2017 = vpow2.f32 %v1617_v10  ;;  %v1081_v52 = vpack.c.bf16 %v1037_v43, %v1035_v40 }
 0x1b3   : > { %v1994_v53 = vpop.eup %1993  ;;  %2019 = vpow2.f32 %v1618_v34 }
 0x1b4   : > { %v2808_v1 = vpop.f32.mrf.mxu1  ;;  %v2810_v62 = vpop.eup %1995  ;;  %2021 = vrcp.f32 %v911_v50  ;;  %v912_v4 = vadd.f32 1.0, %v1994_v53  ;;  %1262 = vmatprep.mubr.bf16.mxu0 %v1081_v52 }
 0x1b5   : > { %v1998_v57 = vpop.eup %1997  ;;  %2023 = vrcp.f32 %v910_v44  ;;  %1263 = vmatmul.mubr.bf16.gmra.mxu0 %v1080_v55 }
 0x1b6   : > { %v2813_v9 = vpop.f32.mrf.mxu1  ;;  %v2000_v12 = vpop.eup %1999  ;;  %2025 = vrcp.f32 %v912_v4  ;;  %v913_v16 = vadd.f32 1.0, %v1998_v57 }
 0x1b7   : > { %v2002_v21 = vpop.eup %2001  ;;  %2027 = vpow2.f32 %v1619_v2  ;;  %v926_v63 = vadd.f32 1.0, %v2000_v12  ;;  %v1016_v12 = vmul.f32 %v2801_v6, %v2698_v0 }
 0x1b8   : > { %v2817_v8 = vpop.f32.mrf.mxu1  ;;  %v2004_v25 = vpop.eup %2003  ;;  %2029 = vrcp.f32 %v913_v16  ;;  %v914_v42 = vadd.f32 1.0, %v2002_v21  ;;  %v1015_v16 = vmul.f32 %v2794_v32, %v2693_v61  ;;  %v1017_v21 = vmul.f32 %v2805_v49, %v2703_v3 }
 0x1b9   : > { %v2006_v26 = vpop.eup %2005  ;;  %2031 = vrcp.f32 %v923_v5  ;;  %v927_v40 = vadd.f32 1.0, %v2004_v25  ;;  %v1014_v5 = vmul.f32 %v2787_v20, %v2688_v58 }
 0x1ba   : > { %v2819_v29 = vpop.f32.mrf.mxu1  ;;  %v2008_v30 = vpop.eup %2007  ;;  %2033 = vrcp.f32 %v924_v13  ;;  %v915_v33 = vadd.f32 1.0, %v2006_v26 }
 0x1bb   : > { %v2010_v10 = vpop.eup %2009  ;;  %2035 = vrcp.f32 %v925_v22  ;;  %v928_v44 = vadd.f32 1.0, %v2008_v30 }
 0x1bc   : > { %v2821_v14 = vpop.f32.mrf.mxu1  ;;  %v2012_v34 = vpop.eup %2011  ;;  %2037 = vrcp.f32 %v915_v33  ;;  %v916_v48 = vadd.f32 1.0, %v2010_v10 }
 0x1bd   : > { %v2014_v37 = vpop.eup %2013  ;;  %2039 = vrcp.f32 %v914_v42  ;;  %v929_v52 = vadd.f32 1.0, %v2012_v34 }
 0x1be   : > { %v2823_v43 = vpop.f32.mrf.mxu1  ;;  %v2016_v60 = vpop.eup %2015  ;;  %2041 = vrcp.f32 %v916_v48  ;;  %v917_v47 = vadd.f32 1.0, %v2014_v37 }
 0x1bf   : > { %v2018_v50 = vpop.eup %2017  ;;  %2043 = vrcp.f32 %v926_v63  ;;  %v930_v22 = vadd.f32 1.0, %v2016_v60 }
 0x1c0   : > { %v767_v53 = vpop.f32.mrf.mxu1  ;;  %v2020_v2 = vpop.eup %2019  ;;  %2045 = vrcp.f32 %v917_v47  ;;  %v931_v33 = vadd.f32 1.0, %v2018_v50 }
 0x1c1   : > { %v2022_v55 = vpop.eup %2021  ;;  %2047 = vrcp.f32 %v927_v40  ;;  %v2835_v58 = vmul.f32 %v1014_v5, %v767_v53  ;;  %v932_v61 = vadd.f32 1.0, %v2020_v2  ;;  %v1018_v53 = vmul.f32 %v2810_v62, %v2709_v7 }
 0x1c2   : > { %v769_v4 = vpop.f32.mrf.mxu1  ;;  %v2024_v57 = vpop.eup %2023  ;;  %2049 = vrcp.f32 %v928_v44  ;;  %v1007_v42 = vmul.f32 %v2022_v55, %v2735_v27 }
 0x1c3   : > { %v2026_v13 = vpop.eup %2025  ;;  %2051 = vrcp.f32 %v929_v52  ;;  %v1006_v6 = vmul.f32 %v2024_v57, %v2731_v23  ;;  %v2841_v49 = vmul.f32 %v1015_v16, %v769_v4 }
 0x1c4   : > { %v771_v25 = vpop.f32.mrf.mxu1  ;;  %v2028_v26 = vpop.eup %2027  ;;  %v1008_v30 = vmul.f32 %v2026_v13, %v2742_v35  ;;  %2053 = vrcp.f32 %v930_v22  ;;  %v1039_v23 = vmul.f32 %v1007_v42, %v2803_v18 }
 0x1c5   : > { %v2837_v20 = vmul.f32 %v1016_v12, %v771_v25  ;;  %v2030_v0 = vpop.eup %2029  ;;  %v933_v34 = vadd.f32 1.0, %v2028_v26  ;;  %2055 = vrcp.f32 %v931_v33  ;;  %v1038_v47 = vmul.f32 %v1006_v6, %v2799_v38 }
 0x1c6   : > { %v773_v32 = vpop.f32.mrf.mxu1  ;;  %v2032_v10 = vpop.eup %2031  ;;  %v1009_v3 = vmul.f32 %v2030_v0, %v2750_v45  ;;  %v1040_v48 = vmul.f32 %v1008_v30, %v2808_v1  ;;  %2057 = vrcp.f32 %v932_v61 }
 0x1c7   : > { %v1086_v27 = vpack.c.bf16 %v2837_v20, %v2835_v58  ;;  %v2845_v63 = vmul.f32 %v1017_v21, %v773_v32  ;;  %v2034_v35 = vpop.eup %2033  ;;  %v1019_v18 = vmul.f32 %v2032_v10, %v2715_v11  ;;  %2059 = vrcp.f32 %v933_v34 }
 0x1c8   : > { %v777_v37 = vpop.f32.mrf.mxu1  ;;  %v2036_v40 = vpop.eup %2035  ;;  %v1041_v60 = vmul.f32 %v1009_v3, %v2813_v9  ;;  %v1020_v1 = vmul.f32 %v2034_v35, %v2721_v15  ;;  %v1082_v4 = vpack.c.bf16 %v1040_v48, %v1038_v47 }
 0x1c9   : > { %v1087_v45 = vpack.c.bf16 %v2845_v63, %v2841_v49  ;;  %v2038_v44 = vpop.eup %2037  ;;  %v1021_v9 = vmul.f32 %v2036_v40, %v2727_v19  ;;  %v1050_v13 = vmul.f32 %v1018_v53, %v777_v37 }
 0x1ca   : > { %v779_v50 = vpop.f32.mrf.mxu1  ;;  %v2040_v52 = vpop.eup %2039  ;;  %v1083_v2 = vpack.c.bf16 %v1041_v60, %v1039_v23  ;;  %v1011_v38 = vmul.f32 %v2038_v44, %v2762_v17 }
 0x1cb   : > { %v2042_v55 = vpop.eup %2041  ;;  %v1010_v15 = vmul.f32 %v2040_v52, %v2756_v56  ;;  %v1051_v19 = vmul.f32 %v1019_v18, %v779_v50 }
 0x1cc   : > { %v781_v57 = vpop.f32.mrf.mxu1  ;;  %v2044_v5 = vpop.eup %2043  ;;  %v1012_v12 = vmul.f32 %v2042_v55, %v2770_v39  ;;  %1270 = vmatprep.mubr.bf16.mxu0 %v1083_v2  ;;  %v1043_v39 = vmul.f32 %v1011_v38, %v2819_v29 }
 0x1cd   : > { %v1052_v7 = vmul.f32 %v1020_v1, %v781_v57  ;;  %v2046_v62 = vpop.eup %2045  ;;  %1271 = vmatmul.mubr.bf16.gmra.mxu0 %v1082_v4  ;;  %v1042_v56 = vmul.f32 %v1010_v15, %v2817_v8  ;;  %v1022_v61 = vmul.f32 %v2044_v5, %v2733_v24 }
 0x1ce   : > { %v783_v16 = vpop.f32.mrf.mxu1  ;;  %v2048_v21 = vpop.eup %2047  ;;  %v1013_v11 = vmul.f32 %v2046_v62, %v2783_v54  ;;  %v1044_v42 = vmul.f32 %v1012_v12, %v2821_v14 }
 0x1cf   : > { %v1088_v22 = vpack.c.bf16 %v1052_v7, %v1050_v13  ;;  %v1053_v25 = vmul.f32 %v1021_v9, %v783_v16  ;;  %v2050_v26 = vpop.eup %2049  ;;  %v1023_v49 = vmul.f32 %v2048_v21, %v2737_v28 }
 0x1d0   : > { %v787_v17 = vpop.f32.mrf.mxu1  ;;  %v2052_v30 = vpop.eup %2051  ;;  %v1045_v0 = vmul.f32 %v1013_v11, %v2823_v43  ;;  %v1024_v54 = vmul.f32 %v2050_v26, %v2739_v31  ;;  %v1084_v10 = vpack.c.bf16 %v1044_v42, %v1042_v56 }
 0x1d1   : > { %v1089_v6 = vpack.c.bf16 %v1053_v25, %v1051_v19  ;;  %v1025_v14 = vmul.f32 %v2052_v30, %v2744_v36  ;;  %v1054_v63 = vmul.f32 %v1022_v61, %v787_v17  ;;  %v2054_v35 = vpop.eup %2053 }
 0x1d2   : > { %v789_v33 = vpop.f32.mrf.mxu1  ;;  %v1085_v32 = vpack.c.bf16 %v1045_v0, %v1043_v39  ;;  %v2056_v34 = vpop.eup %2055  ;;  %v1026_v28 = vmul.f32 %v2054_v35, %v2748_v41 }
 0x1d3   : > { %v1055_v8 = vmul.f32 %v1023_v49, %v789_v33  ;;  %v2058_v37 = vpop.eup %2057  ;;  %v1027_v47 = vmul.f32 %v2056_v34, %v2752_v46 }
 0x1d4   : > { %v791_v3 = vpop.f32.mrf.mxu1  ;;  %1278 = vmatprep.mubr.bf16.mxu0 %v1085_v32  ;;  %v2060_v40 = vpop.eup %2059  ;;  %v1028_v36 = vmul.f32 %v2058_v37, %v2754_v51 }
 0x1d5   : > { %v1056_v29 = vmul.f32 %v1024_v54, %v791_v3  ;;  %1279 = vmatmul.mubr.bf16.gmra.mxu0 %v1084_v10  ;;  %v1029_v50 = vmul.f32 %v2060_v40, %v2758_v59 }
 0x1d6   : > { %v793_v43 = vpop.f32.mrf.mxu1  ;;  %1286 = vmatprep.mubr.bf16.mxu0 %v1087_v45 }
 0x1d7   : > { %v1090_v48 = vpack.c.bf16 %v1056_v29, %v1054_v63  ;;  %v1057_v24 = vmul.f32 %v1025_v14, %v793_v43 }
 0x1d8   : > { %v797_v31 = vpop.f32.mrf.mxu1 }
 0x1d9   : > { %v1091_v23 = vpack.c.bf16 %v1057_v24, %v1055_v8  ;;  %v1058_v52 = vmul.f32 %v1026_v28, %v797_v31 }
 0x1da   : > { %v799_v60 = vpop.f32.mrf.mxu1 }
 0x1db   : > { %v1059_v1 = vmul.f32 %v1027_v47, %v799_v60 }
 0x1dc   : > { %v801_v44 = vpop.f32.mrf.mxu1 }
 0x1dd   : > { %v1060_v45 = vmul.f32 %v1028_v36, %v801_v44  ;;  %1287 = vmatmul.mubr.bf16.gmra.mxu0 %v1086_v27 }
 0x1de   : > { %v803_v53 = vpop.f32.mrf.mxu1  ;;  %1294 = vmatprep.mubr.bf16.mxu0 %v1089_v6 }
 0x1df   : > { %v1092_v2 = vpack.c.bf16 %v1060_v45, %v1058_v52  ;;  %v1061_v55 = vmul.f32 %v1029_v50, %v803_v53 }
 0x1e1   : > { %v1093_v41 = vpack.c.bf16 %v1061_v55, %v1059_v1 }
 0x1e5   : > { %1295 = vmatmul.mubr.bf16.gmra.mxu0 %v1088_v22 }
 0x1e6   : > { %1302 = vmatprep.mubr.bf16.mxu0 %v1091_v23 }
 0x1ed   : > { %1303 = vmatmul.mubr.bf16.gmra.mxu0 %v1090_v48 }
 0x1ee   : > { %1310 = vmatprep.mubr.bf16.mxu0 %v1093_v41 }
 0x1f5   : > { %1311 = vmatmul.mubr.bf16.gmra.mxu0 %v1092_v2 }
 0x26d   : > { %v1661_v46 = vpop.f32.mrf.mxu0 }
 0x26f   : > { %v1662_v51 = vpop.f32.mrf.mxu0 }
 0x270   : > { %v1663_v59 = vadd.f32 %v1662_v51, %v1661_v46 }
 0x271   : > { %v1664_v18 = vpop.f32.mrf.mxu0 }
 0x272   : > { %1370 = vst [vmem:[%s2878_s9] sm:$0xff] %v1663_v59 }
 0x273   : > { %v1665_v58 = vpop.f32.mrf.mxu0 }
 0x274   : > { %v1666_v20 = vadd.f32 %v1665_v58, %v1664_v18 }
 0x275   : > { %v1667_v27 = vpop.f32.mrf.mxu0 }
 0x276   : > { %1371 = vst [vmem:[%s2878_s9 + $0x8] sm:$0xff] %v1666_v20 }
 0x277   : > { %v1668_v9 = vpop.f32.mrf.mxu0 }
 0x278   : > { %v1669_v4 = vadd.f32 %v1668_v9, %v1667_v27 }
 0x279   : > { %v1670_v57 = vpop.f32.mrf.mxu0 }
 0x27a   : > { %1372 = vst [vmem:[%s2878_s9 + $0x10] sm:$0xff] %v1669_v4 }
 0x27b   : > { %v1671_v5 = vpop.f32.mrf.mxu0 }
 0x27c   : > { %v1672_v38 = vadd.f32 %v1671_v5, %v1670_v57 }
 0x27e   : > { %1373 = vst [vmem:[%s2878_s9 + $0x18] sm:$0xff] %v1672_v38 }
 0x28d   : > { %v1673_v12 = vpop.f32.mrf.mxu0 }
 0x28f   : > { %v1674_v13 = vpop.f32.mrf.mxu0 }
 0x290   : > { %v1675_v7 = vadd.f32 %v1674_v13, %v1673_v12 }
 0x291   : > { %v1676_v62 = vpop.f32.mrf.mxu0 }
 0x292   : > { %1374 = vst [vmem:[%s2878_s9 + $0x20] sm:$0xff] %v1675_v7 }
 0x293   : > { %v1677_v15 = vpop.f32.mrf.mxu0 }
 0x294   : > { %v1678_v16 = vadd.f32 %v1677_v15, %v1676_v62 }
 0x295   : > { %v1679_v21 = vpop.f32.mrf.mxu0 }
 0x296   : > { %1375 = vst [vmem:[%s2878_s9 + $0x28] sm:$0xff] %v1678_v16 }
 0x297   : > { %v1680_v11 = vpop.f32.mrf.mxu0 }
 0x298   : > { %v1681_v19 = vadd.f32 %v1680_v11, %v1679_v21 }
 0x299   : > { %v1682_v22 = vpop.f32.mrf.mxu0 }
 0x29a   : > { %1376 = vst [vmem:[%s2878_s9 + $0x30] sm:$0xff] %v1681_v19 }
 0x29b   : > { %v1683_v25 = vpop.f32.mrf.mxu0 }
 0x29c   : > { %v1684_v26 = vadd.f32 %v1683_v25, %v1682_v22 }
 0x29d   : > { %v1685_v42 = vpop.f32.mrf.mxu0 }
 0x29e   : > { %1377 = vst [vmem:[%s2878_s9 + $0x38] sm:$0xff] %v1684_v26 }
 0x29f   : > { %v1686_v17 = vpop.f32.mrf.mxu0 }
 0x2a0   : > { %v1687_v30 = vadd.f32 %v1686_v17, %v1685_v42 }
 0x2a1   : > { %v1688_v39 = vpop.f32.mrf.mxu0 }
 0x2a2   : > { %1378 = vst [vmem:[%s2878_s9 + $0x40] sm:$0xff] %v1687_v30 }
 0x2a3   : > { %v1689_v0 = vpop.f32.mrf.mxu0 }
 0x2a4   : > { %v1690_v6 = vadd.f32 %v1689_v0, %v1688_v39 }
 0x2a5   : > { %v1691_v56 = vpop.f32.mrf.mxu0 }
 0x2a6   : > { %1379 = vst [vmem:[%s2878_s9 + $0x48] sm:$0xff] %v1690_v6 }
 0x2a7   : > { %v1692_v33 = vpop.f32.mrf.mxu0 }
 0x2a8   : > { %v1693_v61 = vadd.f32 %v1692_v33, %v1691_v56 }
 0x2a9   : > { %v1694_v54 = vpop.f32.mrf.mxu0 }
 0x2aa   : > { %1380 = vst [vmem:[%s2878_s9 + $0x50] sm:$0xff] %v1693_v61 }
 0x2ab   : > { %v1695_v32 = vpop.f32.mrf.mxu0 }
 0x2ac   : > { %v1696_v10 = vadd.f32 %v1695_v32, %v1694_v54 }
 0x2ad   : > { %v1697_v3 = vpop.f32.mrf.mxu0 }
 0x2ae   : > { %1381 = vst [vmem:[%s2878_s9 + $0x58] sm:$0xff] %v1696_v10 }
 0x2af   : > { %v1698_v49 = vpop.f32.mrf.mxu0 }
 0x2b0   : > { %v1699_v14 = vadd.f32 %v1698_v49, %v1697_v3 }
 0x2b1   : > { %v1700_v63 = vpop.f32.mrf.mxu0 }
 0x2b2   : > { %1382 = vst [vmem:[%s2878_s9 + $0x60] sm:$0xff] %v1699_v14 }
 0x2b3   : > { %v1701_v29 = vpop.f32.mrf.mxu0 }
 0x2b4   : > { %v1702_v35 = vadd.f32 %v1701_v29, %v1700_v63 }
 0x2b5   : > { %v1703_v43 = vpop.f32.mrf.mxu0 }
 0x2b6   : > { %1383 = vst [vmem:[%s2878_s9 + $0x68] sm:$0xff] %v1702_v35 }
 0x2b7   : > { %v1704_v34 = vpop.f32.mrf.mxu0 }
 0x2b8   : > { %v1705_v8 = vadd.f32 %v1704_v34, %v1703_v43 }
 0x2b9   : > { %v1706_v48 = vpop.f32.mrf.mxu0 }
 0x2ba   : > { %1384 = vst [vmem:[%s2878_s9 + $0x70] sm:$0xff] %v1705_v8 }
 0x2bb   : > { %v1707_v24 = vpop.f32.mrf.mxu0 }
 0x2bc   : > { %v1708_v37 = vadd.f32 %v1707_v24, %v1706_v48 }
 0x2be   : > { %1385 = vst [vmem:[%s2878_s9 + $0x78] sm:$0xff] %v1708_v37 }
 0x2bf   : > { %2166 = shalt.err (!%p2163_p3)
}
 0x2c0   : > { %s2167_s2 = scalar_lea.hbm %s2900_s16, 2048  ;;  %s2171_s14 = scalar_lea.hbm %s3019_s6, 4096 }
 0x2c1   : > { %p2168_p9 = scmp.ne.s32.totalorder %s2900_s16, %s2167_s2  ;;  %p2172_p5 = scmp.lt.s32.totalorder %s2900_s16, %s3019_s6 }
 0x2c2   : > { %p2173_p10 = scmp.lt.s32.totalorder %s2171_s14, %s2167_s2 }
 0x2c3   : > { %p2169_p4 = pnand %p2168_p9, %p3020_p12 }
 0x2c4   : > { %p2174_p1 = por %p2173_p10, %p2172_p5 }
 0x2c5   : > { %p2170_p11 = pneg %p2169_p4 }
 0x2c7   : > { %p2175_p0 = pnand %p2174_p1, %p2170_p11 }
 0x2c9   : > { %2178 = shalt.err (!%p2175_p0)
}
 0x2ca   : > { %s2303_s9 = smov 128   ;;  %s2304_s15 = smov 8  }
 0x2cb   : > { %1735 = dma.vmem_to_hbm [thread:$0]  (%p3020_p12), %s2902_s21, 2048, %s2900_s16, %s1387_s12, %s2303_s9, %s2303_s9, %s2304_s15  }
 0x2cc PF: > { %s3021_s0 = sld [smem:[#allocation25_spill]]  ;;  %s1415_s4 = sand.u32 1, %s2271_s23  }
 0x2cd   : > { %p3023_p6 = scmp.ge.s32.totalorder %s2291_s28, 2  ;;  %s1416_s5 = scalar_lea.sflag [#allocation7], %s1415_s4 }
 0x2d2   : > { %p3022_p2 = scmp.ne.s32.totalorder %s3021_s0, 0 }
 0x2d4   : > { %p1752_p7 = pnand %p3023_p6, %p3022_p2 }
 0x2d6   : > { %p1753_p8 = pneg %p1752_p7 }
 0x2d8   : > { %2242 = dma.done.wait (%p1753_p8), %s1416_s5, 2048  }
 0x2d9   : > { %2244 = vsyncadd (%p1753_p8), %s1416_s5, 4294965248  ;;  %s27_s28 = sadd.s32 1, %s2291_s28   ;;  %s3024_s7 = smov %s2546_s18 }
 0x2da   : > { %p24_p13 = scmp.ge.s32.totalorder %s27_s28, 4   ;;  %s3025_s17 = sld [smem:[#allocation21_spill]] }
 0x2db   : > { %s3026_s0 = sld [smem:[#allocation23_spill]]  ;;  %s3029_s18 = smov %s2251_s19 }
 0x2dc   : > { %s3027_s16 = sld [smem:[#allocation22_spill]]  ;;  %s3030_s19 = smov %s2255_s20 }
 0x2dd   : > { %s3028_s25 = sld [smem:[#allocation24_spill]]  ;;  %s3031_s20 = smov %s3024_s7 }
 0x2de   : > { %s3032_s21 = smov %s2263_s22  ;;  %s3034_s23 = smov %s2275_s24 }
 0x2df   : > { %s3036_s26 = smov %s2287_s27  ;;  %s3037_s27 = smov %s3039_s30 }
 0x2e0   : > { %s3033_s22 = smov %s3025_s17  ;;  %26 = sbr.rel (!%p24_p13) target bundleno = 18 (0x12), region = 109 }
 0x2e2   : > { %s3035_s24 = smov %s3027_s16 }
 0x2e5   :  { %1421 = vsyncpa [#allocation6], 1 }
 0x2e6   :  { %1423 = vsyncpa [#allocation6 + $0x1], 1 }
 0x2e7   :  { %1424 = vsyncpa [#allocation9], 1 }
 0x2e8   :  { %1426 = vsyncpa [#allocation9 + $0x1], 1 }
 0x2e9   :  { %1427 = vsyncpa [#allocation7], 1 }
 0x2ea   :  { %1429 = vsyncpa [#allocation7 + $0x1], 1 }

</bundles_post_ra>
